<compile_context>
chip_gen: v6e
topology: v6e:2x2x1
jax: 0.10.0
libtpu: 0.0.40
codegen_flags: <defaults>
</compile_context>

<pallas_src>
import math

import numpy as np
import jax
import jax.numpy as jnp
from jax import lax
from jax.experimental import pallas as pl
from jax.experimental.pallas import tpu as pltpu

# murmur3-style odd constants (as int32 two's complement).
_P1 = np.int32(-1640531535)   # 0x9E3779B1
_P2 = np.int32(-862048943)    # 0xCC9E2D51
_M1 = np.int32(-2048144789)   # 0x85EBCA6B
_M2 = np.int32(-1028477387)   # 0xC2B2AE35
_INT32_MIN = np.int32(-2147483648)
_INT32_MAX = np.int32(2147483647)


def _fmix32(h):
    """murmur3 finalizer: int32 -> well-mixed int32 (works in and out of kernels)."""
    h = h ^ lax.shift_right_logical(h, np.int32(16))
    h = h * _M1
    h = h ^ lax.shift_right_logical(h, np.int32(13))
    h = h * _M2
    h = h ^ lax.shift_right_logical(h, np.int32(16))
    return h


def _keep(ar_ref, bc_ref, t_ref):
    """Bernoulli keep-mask: hash(row, col, seed) < per-feature int32 threshold."""
    h = ar_ref[...] + bc_ref[...]                      # (tb,1) + (1,tf) -> (tb,tf)
    h = h ^ lax.shift_right_logical(h, np.int32(15))
    h = h * _M2
    h = h ^ lax.shift_right_logical(h, np.int32(13))
    return h < t_ref[...]


def _xout_kernel(t_ref, bc_ref, ar_ref, x_ref, xout_ref):
    keep = _keep(ar_ref, bc_ref, t_ref)
    xout_ref[...] = jnp.where(keep, x_ref[...], jnp.zeros((), x_ref.dtype))


def _xout_mask_kernel(t_ref, bc_ref, ar_ref, x_ref, xout_ref, mask_ref):
    keep = _keep(ar_ref, bc_ref, t_ref)
    mask_ref[...] = keep.astype(mask_ref.dtype)
    xout_ref[...] = jnp.where(keep, x_ref[...], jnp.zeros((), x_ref.dtype))


def _mask_kernel(t_ref, bc_ref, ar_ref, mask_ref):
    mask_ref[...] = _keep(ar_ref, bc_ref, t_ref).astype(mask_ref.dtype)


def _pick_tiles(batch, feat, itemsize, n_big_arrays):
    """(tb, tf): footprint ~ n_big_arrays * 2(double-buffer) * tb*tf*itemsize <= ~20 MiB."""
    sub = 8 if itemsize >= 4 else (16 if itemsize == 2 else 32)
    tf = feat if feat <= 2048 else 2048            # lane-dense feature tile
    budget = 20 * 1024 * 1024
    per_row = max(1, tf * itemsize * n_big_arrays * 2)
    tb = (budget // per_row // sub) * sub
    b_up = pl.cdiv(batch, sub) * sub               # never exceed (rounded-up) batch
    tb = min(max(tb, sub), 4096, b_up)
    if batch >= 2 * sub:                           # >=2 batch blocks => both v7x TCs busy
        half = pl.cdiv(pl.cdiv(batch, 2), sub) * sub
        tb = min(tb, half)
    return max(tb, sub), tf


def switch_forward(x, logits, key, *, tau=1.0, eps=1e-10, force_proba=None,
                   return_mask=False, return_x_and_mask=False, mask_dtype=None):
    """Hard concrete switch forward: xout = x * mask, mask ~ Bernoulli(sigmoid(dl)).

    tau/eps are accepted for API compatibility; the hard forward mask does not
    depend on them (they cancel in the argmax comparison).
    """
    del tau, eps
    orig_shape = x.shape
    B = orig_shape[0]
    F = int(math.prod(orig_shape[1:]))
    x2 = x.reshape(B, F)
    logits2 = jnp.asarray(logits, jnp.float32).reshape(2, F)

    # P(mask == 1) per feature; force_proba replaces the class probabilities.
    if force_proba is not None:
        p = jnp.full((F,), float(force_proba), dtype=jnp.float32)
    else:
        p = jax.nn.sigmoid(logits2[1] - logits2[0])

    # Integer-domain threshold: P(h < t) = (t + 2^31) / 2^32 = p for h ~ U(int32).
    t_mid = jnp.clip(jnp.round((p - 0.5) * 4294967296.0),
                     -2147483520.0, 2147483520.0).astype(jnp.int32)
    t = jnp.where(p <= 0.0, _INT32_MIN,
                  jnp.where(p >= 1.0, _INT32_MAX, t_mid)).reshape(1, F)

    # Per-call seeds -> well-mixed per-row / per-column int32 bases (tiny arrays).
    seeds = jax.random.randint(key, (2,), -(2 ** 31), 2 ** 31 - 1, dtype=jnp.int32)
    rows = jnp.arange(B, dtype=jnp.int32).reshape(B, 1)
    cols = jnp.arange(F, dtype=jnp.int32).reshape(1, F)
    ar = _fmix32(seeds[0] + rows * _P1)            # (B, 1) int32
    bc = _fmix32(seeds[1] ^ (cols * _P2))          # (1, F) int32

    itemsize = jnp.dtype(x.dtype).itemsize
    n_big = 3 if return_x_and_mask else (1 if return_mask else 2)
    tb, tf = _pick_tiles(B, F, itemsize, n_big)
    grid = (pl.cdiv(B, tb), pl.cdiv(F, tf))        # edge blocks are masked by Pallas

    t_spec = pl.BlockSpec((1, tf), lambda i, j: (0, j))
    bc_spec = pl.BlockSpec((1, tf), lambda i, j: (0, j))
    ar_spec = pl.BlockSpec((tb, 1), lambda i, j: (i, 0))
    big_spec = pl.BlockSpec((tb, tf), lambda i, j: (i, j))
    cparams = pltpu.CompilerParams(
        dimension_semantics=("parallel", "parallel"),
        vmem_limit_bytes=32 * 1024 * 1024)
    mdt = x.dtype if mask_dtype is None else mask_dtype

    if return_mask:
        mask = pl.pallas_call(
            _mask_kernel,
            out_shape=jax.ShapeDtypeStruct((B, F), mdt),
            grid=grid,
            in_specs=[t_spec, bc_spec, ar_spec],
            out_specs=big_spec,
            compiler_params=cparams,
        )(t, bc, ar)
        return mask.reshape(orig_shape)

    if return_x_and_mask:
        xout, mask = pl.pallas_call(
            _xout_mask_kernel,
            out_shape=(jax.ShapeDtypeStruct((B, F), x.dtype),
                       jax.ShapeDtypeStruct((B, F), mdt)),
            grid=grid,
            in_specs=[t_spec, bc_spec, ar_spec, big_spec],
            out_specs=(big_spec, big_spec),
            compiler_params=cparams,
        )(t, bc, ar, x2)
        return xout.reshape(orig_shape), mask.reshape(orig_shape)

    # Common path: only xout is needed -> no HBM writes for the mask.
    xout = pl.pallas_call(
        _xout_kernel,
        out_shape=jax.ShapeDtypeStruct((B, F), x.dtype),
        grid=grid,
        in_specs=[t_spec, bc_spec, ar_spec, big_spec],
        out_specs=big_spec,
        compiler_params=cparams,
    )(t, bc, ar, x2)
    return xout.reshape(orig_shape)


if __name__ == "__main__":
    # Switch(shape=(4, 32)), batch of 16 -> x: (16, 4, 32), logits: (2, 4, 32)
    B, C, W = 16, 4, 32
    key = jax.random.PRNGKey(0)
    kx, kg = jax.random.split(key)

    x = jax.random.normal(kx, (B, C, W), dtype=jnp.float32)
    logits = jnp.ones((2, C, W), dtype=jnp.float32)
    # Perturb class-1 logits so the mask is not trivially all-ones.
    logits = logits.at[1].add(jnp.linspace(-2.0, 2.0, C * W).reshape(C, W))

    xout, mask = switch_forward(x, logits, kg, return_x_and_mask=True)
    xout, mask = jax.block_until_ready((xout, mask))
    assert xout.shape == (B, C, W) and mask.shape == (B, C, W)
    assert bool(jnp.all((mask == 0.0) | (mask == 1.0)))
    assert bool(jnp.allclose(xout, x * mask))

    # xout-only path (no mask HBM writes) — same key -> same mask.
    xout_only = jax.block_until_ready(switch_forward(x, logits, kg))
    assert bool(jnp.allclose(xout_only, xout))

    # mask-only path — same key -> same mask.
    mask_only = jax.block_until_ready(
        switch_forward(x, logits, kg, return_mask=True))
    assert bool(jnp.allclose(mask_only, mask))

    # force_proba=0.0 -> mask is exactly all zeros -> xout is all zeros.
    xout_fp0 = jax.block_until_ready(
        switch_forward(x, logits, kg, force_proba=0.0))
    assert bool(jnp.allclose(xout_fp0, jnp.zeros_like(x)))

    # Statistical sanity: empirical keep-rate tracks mean sigmoid(delta-logits).
    p_mean = float(jnp.mean(jax.nn.sigmoid(logits[1] - logits[0])))
    m_mean = float(jnp.mean(mask))
    assert abs(m_mean - p_mean) < 0.1, (m_mean, p_mean)

    print("KERNEL_OK")
</pallas_src>

<mosaic_0001>
module attributes {stable_mosaic.version = 11 : i64} {
  func.func @_xout_mask_kernel(%arg0: i32, %arg1: i32, %arg2: memref<1x128xi32, #tpu.memory_space<vmem>>, %arg3: memref<1x128xi32, #tpu.memory_space<vmem>>, %arg4: memref<8x1xi32, #tpu.memory_space<vmem>>, %arg5: memref<8x128xf32, #tpu.memory_space<vmem>>, %arg6: memref<8x128xf32, #tpu.memory_space<vmem>>, %arg7: memref<8x128xf32, #tpu.memory_space<vmem>>) attributes {dimension_semantics = [#tpu.dimension_semantics<parallel>, #tpu.dimension_semantics<parallel>], iteration_bounds = array<i64: 2, 1>, scalar_prefetch = 0 : i64, scratch_operands = 0 : i64, tpu.core_type = #tpu.core_type<tc>, window_params = [{transform_indices = @transform_0, window_bounds = array<i64: 1, 128>}, {transform_indices = @transform_1, window_bounds = array<i64: 1, 128>}, {transform_indices = @transform_2, window_bounds = array<i64: 8, 1>}, {transform_indices = @transform_3, window_bounds = array<i64: 8, 128>}, {transform_indices = @transform_4, window_bounds = array<i64: 8, 128>}, {transform_indices = @transform_5, window_bounds = array<i64: 8, 128>}]} {
    %c0 = arith.constant 0 : index
    %c0_0 = arith.constant 0 : index
    %0 = vector.load %arg4[%c0, %c0_0] : memref<8x1xi32, #tpu.memory_space<vmem>>, vector<8x1xi32>
    %c0_1 = arith.constant 0 : index
    %c0_2 = arith.constant 0 : index
    %1 = vector.load %arg3[%c0_1, %c0_2] : memref<1x128xi32, #tpu.memory_space<vmem>>, vector<1x128xi32>
    %2 = vector.broadcast %0 : vector<8x1xi32> to vector<8x128xi32>
    %3 = vector.broadcast %1 : vector<1x128xi32> to vector<8x128xi32>
    %4 = arith.addi %2, %3 : vector<8x128xi32>
    %c15_i32 = arith.constant 15 : i32
    %5 = vector.broadcast %c15_i32 : i32 to vector<8x128xi32>
    %6 = arith.shrui %4, %5 : vector<8x128xi32>
    %7 = arith.xori %4, %6 : vector<8x128xi32>
    %c-1028477387_i32 = arith.constant -1028477387 : i32
    %8 = vector.broadcast %c-1028477387_i32 : i32 to vector<8x128xi32>
    %9 = arith.muli %7, %8 : vector<8x128xi32>
    %c13_i32 = arith.constant 13 : i32
    %10 = vector.broadcast %c13_i32 : i32 to vector<8x128xi32>
    %11 = arith.shrui %9, %10 : vector<8x128xi32>
    %12 = arith.xori %9, %11 : vector<8x128xi32>
    %c0_3 = arith.constant 0 : index
    %c0_4 = arith.constant 0 : index
    %13 = vector.load %arg2[%c0_3, %c0_4] : memref<1x128xi32, #tpu.memory_space<vmem>>, vector<1x128xi32>
    %14 = vector.broadcast %13 : vector<1x128xi32> to vector<8x128xi32>
    %15 = arith.cmpi slt, %12, %14 : vector<8x128xi32>
    %16 = arith.extui %15 : vector<8x128xi1> to vector<8x128xi32>
    %17 = arith.sitofp %16 : vector<8x128xi32> to vector<8x128xf32>
    %c0_5 = arith.constant 0 : index
    %c0_6 = arith.constant 0 : index
    %18 = vector.load %arg7[%c0_5, %c0_6] : memref<8x128xf32, #tpu.memory_space<vmem>>, vector<8x128xf32>
    tpu.vector_store %arg7[%c0_5, %c0_6], %17 {strides = array<i32>} : memref<8x128xf32, #tpu.memory_space<vmem>>, vector<8x128xf32>,
    %c0_7 = arith.constant 0 : index
    %c0_8 = arith.constant 0 : index
    %19 = vector.load %arg5[%c0_7, %c0_8] : memref<8x128xf32, #tpu.memory_space<vmem>>, vector<8x128xf32>
    %cst = arith.constant 0.000000e+00 : f32
    %20 = vector.broadcast %cst : f32 to vector<8x128xf32>
    %21 = arith.select %15, %19, %20 : vector<8x128xi1>, vector<8x128xf32>
    %c0_9 = arith.constant 0 : index
    %c0_10 = arith.constant 0 : index
    %22 = vector.load %arg6[%c0_9, %c0_10] : memref<8x128xf32, #tpu.memory_space<vmem>>, vector<8x128xf32>
    tpu.vector_store %arg6[%c0_9, %c0_10], %21 {strides = array<i32>} : memref<8x128xf32, #tpu.memory_space<vmem>>, vector<8x128xf32>,
    return
  }
  func.func @transform_0(%arg0: i32, %arg1: i32) -> (i32, i32) {
    %c0_i32 = arith.constant 0 : i32
    %c0_i32_0 = arith.constant 0 : i32
    return %c0_i32, %arg1 : i32, i32
  }
  func.func @transform_1(%arg0: i32, %arg1: i32) -> (i32, i32) {
    %c0_i32 = arith.constant 0 : i32
    %c0_i32_0 = arith.constant 0 : i32
    return %c0_i32, %arg1 : i32, i32
  }
  func.func @transform_2(%arg0: i32, %arg1: i32) -> (i32, i32) {
    %c0_i32 = arith.constant 0 : i32
    %c0_i32_0 = arith.constant 0 : i32
    return %arg0, %c0_i32 : i32, i32
  }
  func.func @transform_3(%arg0: i32, %arg1: i32) -> (i32, i32) {
    %c0_i32 = arith.constant 0 : i32
    return %arg0, %arg1 : i32, i32
  }
  func.func @transform_4(%arg0: i32, %arg1: i32) -> (i32, i32) {
    %c0_i32 = arith.constant 0 : i32
    return %arg0, %arg1 : i32, i32
  }
  func.func @transform_5(%arg0: i32, %arg1: i32) -> (i32, i32) {
    %c0_i32 = arith.constant 0 : i32
    return %arg0, %arg1 : i32, i32
  }
}

</mosaic_0001>

<bundles_post_ra>
// kernel: tpu_custom_call.1
= control target key start
LH: loop header
LB: loop body
LE: loop exit
PB: predicated region body
PF: predicated region fallthrough
CT: control target
= control target key end

     0   :  { %s881_s0 = inlined_call_operand.vmem [shape: s32[1,128], index: 0, kind: input, shape index: {}]   ;;  %s882_s1 = inlined_call_operand.vmem [shape: s32[1,128], index: 1, kind: input, shape index: {}]   ;;  %s883_s2 = inlined_call_operand.vmem [shape: s32[16,1], index: 2, kind: input, shape index: {}]   ;;  %s884_s3 = inlined_call_operand.vmem [shape: f32[16,128], index: 3, kind: input, shape index: {}]   ;;  %s885_s4 = inlined_call_operand.hbm [shape: f32[16,128], index: 4, kind: output, shape index: {0}]   ;;  %s886_s5 = inlined_call_operand.hbm [shape: f32[16,128], index: 5, kind: output, shape index: {1}]  }
   0x1   :  { %887 = sst [smem:[#allocation8_spill]] %s882_s1 }
   0x2   :  { %11 = vsyncpa [#allocation3], 0 }
   0x3   :  { %13 = vsyncpa [#allocation3 + $0x1], 0 }
   0x4   :  { %14 = vsyncpa [#allocation5], 0 }
   0x5   :  { %16 = vsyncpa [#allocation5 + $0x1], 0  ;;  %s729_s18 = smov 0   ;;  %s731_s19 = smov 0  }
   0x6   :  { %s733_s20 = smov 0   ;;  %s735_s21 = smov 0  }
   0x7   :  { %s737_s22 = smov 0   ;;  %s739_s23 = smov 0  }
   0x8 LB: > { %s504_s24 = sadd.s32 4294967295, %s693_s23   ;;  %s505_s25 = sadd.s32 4294967294, %s693_s23   ;;  %s693_s23 = sphi %s739_s23, %s22_s23   ;;  %s689_s22 = sphi %s737_s22, %s895_s22   ;;  %s685_s21 = sphi %s735_s21, %s894_s21   ;;  %s681_s20 = sphi %s733_s20, %s893_s20   ;;  %s677_s19 = sphi %s731_s19, %s892_s19   ;;  %s673_s18 = sphi %s729_s18, %s891_s18  }
   0x9   : > { %s34_s26 = sadd.s32 1, %s689_s22  ;;  %s149_s27 = sadd.s32 1, %s681_s20 }
   0xa   : > { %p36_p0 = scmp.ge.s32.totalorder %s34_s26, 2  ;;  %p159_p1 = scmp.ne.s32.totalorder %s681_s20, %s677_s19 }
   0xb   : > { %p160_p2 = scmp.eq.s32.totalorder %s504_s24, 1  ;;  %p165_p3 = scmp.ne.s32.totalorder %s677_s19, %s673_s18 }
   0xc   : > { %s897_s26 = smov (%p36_p0, %s34_s26), 0  ;;  %p166_p5 = scmp.eq.s32.totalorder %s505_s25, 1 }
   0xd   : > { %p769_p4 = por %p160_p2, %p159_p1  ;;  %s144_s29 = ssub.s32 %s689_s22, %s897_s26 }
   0xe   : > { %p510_p6 = scmp.ge.s32.totalorder %s693_s23, 1  ;;  %p147_p7 = scmp.eq.s32.totalorder %s144_s29, 0 }
   0xf   : > { %p776_p8 = por %p166_p5, %p165_p3  ;;  %p241_p9 = scmp.lt.s32.totalorder %s693_s23, 3 }
  0x10   : > { %s782_s6 = scalar_select %p147_p7, %s681_s20, %s149_s27  }
  0x11   : > { %p242_p10 = pnand %p510_p6, %p241_p9 }
  0x12   : > { %p292_p11 = scmp.lt.s32.totalorder (!%p242_p10), %s685_s21, 1  ;;  %s890_s1 = sld [smem:[#allocation8_spill]] (!%p242_p10) }
  0x13   : > { %245 = sbr.rel (%p242_p10) target bundleno = 202 (0xca), region = 36  ;;  %s793_s14 = sand.u32 (!%p242_p10), 1, %s677_s19  }
  0x14   : > { %s511_s15 = sshll.u32 (!%p242_p10), %s793_s14, 3  ;;  %s520_s25 = sshll.u32 (!%p242_p10), %s685_s21, 7 }
  0x15   : > { %s285_s10 = scalar_lea.vmem (!%p242_p10), [#allocation4], %s511_s15  ;;  %s813_s16 = scalar_lea.hbm (!%p242_p10), %s886_s5, %s520_s25 }
  0x18   : > { %v695_v0 = vmov 0   ;;  %s293_s7 = scalar_select %p292_p11, %s685_s21, 1  ;;  %v515_v2 = vld [vmem:[%s890_s1] ss:$0 sm:$0xff]  ;;  %v696_v13 = vmov 0.0  }
  0x19   : > { %586 = vset.pattern.permute.xlu0 %v695_v0  ;;  %v516_v9 = vld [vmem:[%s881_s0] ss:$0 sm:$0xff]  ;;  %s806_s1 = scalar_lea.hbm %s885_s4, %s520_s25 }
  0x1a   : > { %s513_s8 = sshll.u32 %s293_s7, 3  ;;  %s278_s7 = scalar_lea.vmem [#allocation2], %s511_s15 }
  0x1b   : > { %s295_s11 = scalar_lea.vmem %s883_s2, %s513_s8  ;;  %s302_s24 = scalar_lea.vmem %s884_s3, %s513_s8 }
  0x1c   : > { %v303_v1 = vld [vmem:[%s295_s11] sm:$0xff]  ;;  %s350_s9 = sshll.u32 %s278_s7, 4  ;;  %s364_s11 = sshll.u32 %s285_s10, 4  ;;  %s808_s9 = int_to_ptr.vmem [resolvable:$true] %s350_s9  ;;  %s815_s11 = int_to_ptr.vmem [resolvable:$true] %s364_s11 }
  0x1d   : > { %306 = vperm.xlu0 %586, %v303_v1   ;;  %v327_v10 = vld [vmem:[%s302_s24] sm:$0xff]  ;;  %s331_s15 = scalar_lea.sflag [#allocation3], %s793_s14  ;;  %s587_s17 = scalar_lea.vmem %s808_s9, 128 }
  0x1e   : > { %p588_p12 = scmp.ne.s32.totalorder %s808_s9, %s587_s17  ;;  %s697_s24 = smov [#allocation2]  }
  0x1f   : > { %s591_s27 = sshll.u32 %s697_s24, 4  ;;  %s592_s27 = int_to_ptr.vmem [resolvable:$false] %s591_s27 }
  0x20   : > { %p589_p13 = pnand %p588_p12, %p769_p4  ;;  %s593_s29 = scalar_lea.vmem %s592_s27, 256 }
  0x21   : > { %p594_p1 = scmp.lt.s32.totalorder %s808_s9, %s592_s27  ;;  %p595_p2 = scmp.lt.s32.totalorder %s593_s29, %s587_s17 }
  0x22   : > { %p590_p0 = pneg %p589_p13 }
  0x23   : > { %p596_p3 = por %p595_p2, %p594_p1 }
  0x25   : > { %p597_p5 = pnand %p596_p3, %p590_p0 }
  0x98   : > { %v307_v3 = vpop.permute.xlu0 %306 }
  0x99   : > { %v312_v4 = vadd.s32 %v515_v2, %v307_v3 }
  0x9b   : > { %v313_v5 = vshrl.u32 %v312_v4, 15 }
  0x9d   : > { %v314_v6 = vxor.u32 %v313_v5, %v312_v4 }
  0x9f   : > { %v315_v7 = vmul.u32 3266489909, %v314_v6 }
  0xa1   : > { %v316_v8 = vshrl.u32 %v315_v7, 13 }
  0xa3   : > { %v317_v11 = vxor.u32 %v316_v8, %v315_v7 }
  0xa5   : > { %vm323_vm0 = vcmp.lt.s32.totalorder %v317_v11, %v516_v9 }
  0xa6   : > { %v328_v12 = vsel %vm323_vm0, %v327_v10, 0.0  ;;  %v517_v14 = vsel %vm323_vm0, 1.0, %v696_v13 }
  0xa7   : > { %329 = vst [vmem:[%s278_s7] sm:$0xff] %v328_v12  ;;  %326 = vst [vmem:[%s285_s10] sm:$0xff] %v517_v14 }
  0xa8   : > { %600 = shalt.err (!%p597_p5)
}
  0xa9   : > { %s601_s25 = scalar_lea.hbm %s806_s1, 128  ;;  %s605_s12 = scalar_lea.hbm %s885_s4, 256 }
  0xaa   : > { %p602_p6 = scmp.ne.s32.totalorder %s806_s1, %s601_s25  ;;  %p606_p10 = scmp.lt.s32.totalorder %s806_s1, %s885_s4 }
  0xab   : > { %p607_p11 = scmp.lt.s32.totalorder %s605_s12, %s601_s25 }
  0xac   : > { %p603_p7 = pnand %p602_p6, %p769_p4 }
  0xad   : > { %p608_p12 = por %p607_p11, %p606_p10 }
  0xae   : > { %p604_p9 = pneg %p603_p7 }
  0xb0   : > { %p609_p13 = pnand %p608_p12, %p604_p9 }
  0xb2   : > { %612 = shalt.err (!%p609_p13)
}
  0xb3   : > { %524 = dma.vmem_to_hbm [thread:$0]  (%p769_p4), %s808_s9, 128, %s806_s1, %s331_s15  }
  0xb4   : > { %s336_s8 = scalar_lea.sflag [#allocation5], %s793_s14  ;;  %s613_s17 = scalar_lea.vmem %s815_s11, 128 }
  0xb5   : > { %p614_p0 = scmp.ne.s32.totalorder %s815_s11, %s613_s17  ;;  %s698_s24 = smov [#allocation4]  }
  0xb6   : > { %s617_s27 = sshll.u32 %s698_s24, 4  ;;  %s618_s27 = int_to_ptr.vmem [resolvable:$false] %s617_s27 }
  0xb7   : > { %p615_p1 = pnand %p614_p0, %p769_p4  ;;  %s619_s29 = scalar_lea.vmem %s618_s27, 256 }
  0xb8   : > { %p620_p3 = scmp.lt.s32.totalorder %s815_s11, %s618_s27  ;;  %p621_p5 = scmp.lt.s32.totalorder %s619_s29, %s613_s17 }
  0xb9   : > { %p616_p2 = pneg %p615_p1 }
  0xba   : > { %p622_p6 = por %p621_p5, %p620_p3 }
  0xbc   : > { %p623_p7 = pnand %p622_p6, %p616_p2 }
  0xbe   : > { %626 = shalt.err (!%p623_p7)
}
  0xbf   : > { %s627_s1 = scalar_lea.hbm %s813_s16, 128  ;;  %s631_s15 = scalar_lea.hbm %s886_s5, 256 }
  0xc0   : > { %p628_p9 = scmp.ne.s32.totalorder %s813_s16, %s627_s1  ;;  %p632_p12 = scmp.lt.s32.totalorder %s813_s16, %s886_s5 }
  0xc1   : > { %p633_p13 = scmp.lt.s32.totalorder %s631_s15, %s627_s1 }
  0xc2   : > { %p629_p10 = pnand %p628_p9, %p769_p4 }
  0xc3   : > { %p634_p0 = por %p633_p13, %p632_p12 }
  0xc4   : > { %p630_p11 = pneg %p629_p10 }
  0xc6   : > { %p635_p1 = pnand %p634_p0, %p630_p11 }
  0xc8   : > { %638 = shalt.err (!%p635_p1)
}
  0xc9   : > { %525 = dma.vmem_to_hbm [thread:$0]  (%p769_p4), %s815_s11, 128, %s813_s16, %s336_s8  }
  0xca PF: > { %p535_p2 = scmp.ge.s32.totalorder %s693_s23, 2  ;;  %s376_s10 = sand.u32 1, %s673_s18  }
  0xcb   : > { %s377_s12 = scalar_lea.sflag [#allocation3], %s376_s10 }
  0xcc   : > { %p529_p3 = pnand %p535_p2, %p776_p8 }
  0xce   : > { %p530_p5 = pneg %p529_p3 }
  0xd0   : > { %664 = dma.done.wait (%p530_p5), %s377_s12, 128  }
  0xd1   : > { %666 = vsyncadd (%p530_p5), %s377_s12, 4294967168  ;;  %s386_s13 = scalar_lea.sflag [#allocation5], %s376_s10 }
  0xd2   : > { %668 = dma.done.wait (%p530_p5), %s386_s13, 128  }
  0xd3   : > { %670 = vsyncadd (%p530_p5), %s386_s13, 4294967168  ;;  %s22_s23 = sadd.s32 1, %s693_s23   ;;  %s891_s18 = smov %s677_s19 }
  0xd4   : > { %p19_p6 = scmp.ge.s32.totalorder %s22_s23, 4   ;;  %s892_s19 = smov %s681_s20 }
  0xd5   : > { %s893_s20 = smov %s782_s6  ;;  %s894_s21 = smov %s689_s22 }
  0xd6   : > { %s895_s22 = smov %s897_s26  ;;  %21 = sbr.rel (!%p19_p6) target bundleno = 8 (0x8), region = 97 }
  0xdb   :  { %391 = vsyncpa [#allocation3], 1 }
  0xdc   :  { %393 = vsyncpa [#allocation3 + $0x1], 1 }
  0xdd   :  { %394 = vsyncpa [#allocation5], 1 }
  0xde   :  { %396 = vsyncpa [#allocation5 + $0x1], 1 }

</bundles_post_ra>
